<compile_context>
chip_gen: v7x
topology: tpu7x:2x2x1
jax: 0.10.0
libtpu: 0.0.40
codegen_flags: <defaults>
</compile_context>

<pallas_src>
import functools

import jax
import jax.numpy as jnp
from jax.experimental import pallas as pl
from jax.experimental.pallas import tpu as pltpu

DEFAULT_SR = 512  # scaled down from 44100 so the synthetic test signal is small


# ----------------------------------------------------------------------------
# deterministic filter construction (glue, plain JAX)
# ----------------------------------------------------------------------------
def _morlet_bank(n_filt, length, xi_max=0.35, xi_min=0.04):
    """Complex Morlet-like band-pass bank. Returns (real, imag), each (n_filt, length)."""
    t = jnp.arange(length, dtype=jnp.float32) - (length - 1) / 2.0
    if n_filt > 1:
        xis = xi_max * (xi_min / xi_max) ** (
            jnp.arange(n_filt, dtype=jnp.float32) / (n_filt - 1))
    else:
        xis = jnp.array([xi_max], dtype=jnp.float32)
    sigmas = 0.9 / xis
    win = jnp.exp(-0.5 * (t[None, :] / sigmas[:, None]) ** 2)
    phase = 2.0 * jnp.pi * xis[:, None] * t[None, :]
    wr = win * jnp.cos(phase)
    wi = win * jnp.sin(phase)
    nrm = jnp.sqrt(jnp.sum(wr * wr + wi * wi, axis=1, keepdims=True))
    return wr / nrm, wi / nrm


def _toeplitz(filt, n_in, n_out):
    """filt (K, L) -> banded 'same'-convolution matrices (K, n_in, n_out)."""
    L = filt.shape[-1]
    i = jnp.arange(n_in)[:, None]
    o = jnp.arange(n_out)[None, :]
    idx = i - o + (L // 2)
    valid = ((idx >= 0) & (idx < L)).astype(filt.dtype)
    idx_c = jnp.clip(idx, 0, L - 1)
    return filt[:, idx_c] * valid[None, :, :]


# ----------------------------------------------------------------------------
# Pallas kernel: grid = (batch, n2 time wavelets)
# ----------------------------------------------------------------------------
def _jtfs_kernel(frames_ref, w1_ref, ct_ref, cf_ref, pf_ref, pt_ref,
                 out_ref, v_ref, *, keep_time):
    f32 = jnp.float32
    bf16 = jnp.bfloat16

    # ---- first order (runs once per batch element, at k == 0) ---------------
    @pl.when(pl.program_id(1) == 0)
    def _first_order():
        # one stacked matmul gives real and imaginary parts of x (*) psi1
        z = jnp.dot(w1_ref[...], frames_ref[0], preferred_element_type=f32)
        n1p = z.shape[0] // 2
        zr = z[:n1p]
        zi = z[n1p:]
        u1 = jnp.sqrt(zr * zr + zi * zi)                        # (n1p, T1), f32
        # hoist the tiny frequency-wavelet conv out of the k loop:
        #   cf @ (u1 @ ct_k) == (cf @ u1) @ ct_k
        v_ref[...] = jnp.dot(cf_ref[...], u1.astype(bf16),
                             preferred_element_type=f32).astype(bf16)

    # ---- second order: one time wavelet k per grid step ----------------------
    # ct block = [ctr_k | cti_k]  ->  single (2*n_fr*n1p, T1) x (T1, 2*T1) matmul
    prod = jnp.dot(v_ref[...], ct_ref[0], preferred_element_type=f32)
    half = prod.shape[0] // 2            # n_fr * n1p (real-filter rows)
    t1 = prod.shape[1] // 2              # T1
    rr = prod[:half, :t1]                # cfr @ ar
    ri = prod[:half, t1:]                # cfr @ ai
    ir = prod[half:, :t1]                # cfi @ ar
    ii = prod[half:, t1:]                # cfi @ ai

    # both spins share the same four products; sign flips + modulus in f32 (VPU)
    yr_p = rr - ii
    yi_p = ir + ri
    yr_m = rr + ii
    yi_m = ri - ir
    u2p = jnp.sqrt(yr_p * yr_p + yi_p * yi_p)
    u2m = jnp.sqrt(yr_m * yr_m + yi_m * yi_m)
    u2 = jnp.concatenate([u2p, u2m], axis=0).astype(bf16)       # (2*n_fr*n1p, T1)

    # phi_F pooling: one fused small matmul per grid step (rows in path order)
    sp = jnp.dot(pf_ref[...], u2, preferred_element_type=f32)   # (rows_k, T1)

    # phi_T pooling (+ the module's final time mean when keep_time=False)
    if keep_time:
        pooled = jnp.dot(sp.astype(bf16), pt_ref[...],
                         preferred_element_type=f32)            # (rows_k, T_out)
    else:
        pooled = jnp.mean(sp, axis=-1, keepdims=True)           # (rows_k, 1)

    # single block store per grid step (no per-path tiny stores)
    out_ref[0, 0] = pooled.astype(out_ref.dtype)


# ----------------------------------------------------------------------------
# wrapper mimicking the torch module
# ----------------------------------------------------------------------------
class JTFS:
    def __init__(self, J, Q, J_fr, Q_fr, T, F,
                 keep_time_dimension=False, fixed_duration=2.0):
        self.keep_time_dimension = keep_time_dimension
        self.N = int(fixed_duration * DEFAULT_SR)
        self.L1 = 64                      # first-order filter length
        self.T1 = 128                     # scalogram time frames
        self.hop = self.N // self.T1
        assert self.hop >= 1 and self.T1 % T == 0

        self.n1 = J * Q                   # first-order (frequency) channels
        assert self.n1 % F == 0
        self.n1p = ((self.n1 + 7) // 8) * 8   # sublane-padded channel count
        self.n2 = J                       # second-order time wavelets (Q2 = 1)
        self.n_fr = J_fr * Q_fr           # frequency wavelets
        self.n_paths = self.n2 * self.n_fr * 2
        self.F_out = self.n1 // F
        self.T_out = self.T1 // T if keep_time_dimension else 1
        self.rows_k = self.n_fr * 2 * self.F_out   # output rows per k

        f32, bf16 = jnp.float32, jnp.bfloat16

        # ---- psi1: stacked [real; imag], sublane-padded, bf16 MXU operand
        w1r, w1i = _morlet_bank(self.n1, self.L1, xi_max=0.35, xi_min=0.04)
        w1r_p = jnp.zeros((self.n1p, self.L1), f32).at[:self.n1].set(w1r)
        w1i_p = jnp.zeros((self.n1p, self.L1), f32).at[:self.n1].set(w1i)
        self.w1 = jnp.concatenate([w1r_p, w1i_p], axis=0).astype(bf16)   # (2*n1p, L1)

        # ---- psi2 (time): per-k Toeplitz, real|imag fused along N -> (T1, 2*T1)
        p2r, p2i = _morlet_bank(self.n2, 33, xi_max=0.35, xi_min=0.08)
        ctr = _toeplitz(p2r, self.T1, self.T1)
        cti = _toeplitz(p2i, self.T1, self.T1)
        self.ct = jnp.concatenate([ctr, cti], axis=-1).astype(bf16)      # (n2, T1, 2*T1)

        # ---- psi_fr (frequency): all m, real then imag, stacked along M
        #      (spin duplication removed: both spins are rebuilt in-kernel)
        pfr_r, pfr_i = _morlet_bank(self.n_fr, 5, xi_max=0.4, xi_min=0.15)
        cf_r = _toeplitz(pfr_r, self.n1, self.n1)
        cf_i = _toeplitz(pfr_i, self.n1, self.n1)
        cf_r_p = jnp.zeros((self.n_fr, self.n1p, self.n1p), f32)
        cf_r_p = cf_r_p.at[:, :self.n1, :self.n1].set(cf_r)
        cf_i_p = jnp.zeros((self.n_fr, self.n1p, self.n1p), f32)
        cf_i_p = cf_i_p.at[:, :self.n1, :self.n1].set(cf_i)
        self.cf = jnp.concatenate(
            [cf_r_p.reshape(self.n_fr * self.n1p, self.n1p),
             cf_i_p.reshape(self.n_fr * self.n1p, self.n1p)],
            axis=0).astype(bf16)                                          # (2*n_fr*n1p, n1p)

        # ---- phi_F: boxcar pooling fused over all (m, spin), reordered so the
        #      per-k output rows follow path order (m*2 + s)*F_out + f, while the
        #      in-kernel U2 rows are laid out [spin, m, freq(padded to n1p)].
        pblk = jnp.concatenate(
            [jnp.repeat(jnp.eye(self.F_out, dtype=f32), F, axis=1) / F,
             jnp.zeros((self.F_out, self.n1p - self.n1), f32)], axis=1)   # (F_out, n1p)
        sel = jnp.zeros((self.n_fr * 2, self.n_fr * 2), f32)
        for m in range(self.n_fr):
            for s in range(2):
                sel = sel.at[m * 2 + s, s * self.n_fr + m].set(1.0)
        self.pf = jnp.kron(sel, pblk).astype(bf16)                        # (rows_k, 2*n_fr*n1p)

        # ---- phi_T (only consumed when keep_time_dimension=True; otherwise the
        #      kernel uses a lane mean, equal to boxcar phi_T followed by y.mean())
        if keep_time_dimension:
            pt = jnp.repeat(jnp.eye(self.T1 // T, dtype=f32), T, axis=1).T / T
        else:
            pt = jnp.full((self.T1, 1), 1.0 / self.T1, dtype=f32)
        self.pt = pt.astype(bf16)                                         # (T1, T_out)

    def __call__(self, audio):
        B, N = audio.shape
        assert N == self.N
        pad = self.L1 // 2
        x = jnp.pad(audio.astype(jnp.float32), ((0, 0), (pad, pad)))
        # frames[b, l, t] = x_pad[b, l + t*hop]  ->  (B, L1, T1), bf16 MXU operand
        idx = jnp.arange(self.L1)[:, None] + (jnp.arange(self.T1) * self.hop)[None, :]
        frames = x[:, idx].astype(jnp.bfloat16)

        kern = functools.partial(_jtfs_kernel, keep_time=self.keep_time_dimension)

        # advisory cost estimate for XLA scheduling
        def _mm(m, k, n):
            return 2 * m * k * n
        per_k = (_mm(2 * self.n_fr * self.n1p, self.T1, 2 * self.T1)
                 + _mm(self.rows_k, 2 * self.n_fr * self.n1p, self.T1))
        first = (_mm(2 * self.n1p, self.L1, self.T1)
                 + _mm(2 * self.n_fr * self.n1p, self.n1p, self.T1))
        flops = B * (first + self.n2 * per_k)
        transcendentals = B * (self.n1p + self.n2 * 2 * self.n_fr * self.n1p) * self.T1
        bytes_accessed = (frames.size * 2 + B * self.ct.size * 2
                          + self.w1.size * 2 + self.cf.size * 2
                          + self.pf.size * 2 + self.pt.size * 2
                          + B * self.n2 * self.rows_k * self.T_out * 4)

        y = pl.pallas_call(
            kern,
            out_shape=jax.ShapeDtypeStruct(
                (B, self.n2, self.rows_k, self.T_out), jnp.float32),
            grid_spec=pltpu.PrefetchScalarGridSpec(
                num_scalar_prefetch=0,
                grid=(B, self.n2),
                in_specs=[
                    pl.BlockSpec((1, self.L1, self.T1), lambda b, k: (b, 0, 0)),
                    pl.BlockSpec(self.w1.shape, lambda b, k: (0, 0)),
                    pl.BlockSpec((1, self.T1, 2 * self.T1), lambda b, k: (k, 0, 0)),
                    pl.BlockSpec(self.cf.shape, lambda b, k: (0, 0)),
                    pl.BlockSpec(self.pf.shape, lambda b, k: (0, 0)),
                    pl.BlockSpec(self.pt.shape, lambda b, k: (0, 0)),
                ],
                out_specs=pl.BlockSpec(
                    (1, 1, self.rows_k, self.T_out), lambda b, k: (b, k, 0, 0)),
                scratch_shapes=[
                    pltpu.VMEM((2 * self.n_fr * self.n1p, self.T1), jnp.bfloat16)],
            ),
            compiler_params=pltpu.CompilerParams(
                dimension_semantics=("parallel", "arbitrary"),
                vmem_limit_bytes=32 * 1024 * 1024),
            cost_estimate=pl.CostEstimate(
                flops=int(flops), transcendentals=int(transcendentals),
                bytes_accessed=int(bytes_accessed)),
        )(frames, self.w1, self.ct, self.cf, self.pf, self.pt)

        # (B, n2, n_fr*2*F_out, T_out) -> (B, n_paths, F_out, T_out)
        y = y.reshape(B, self.n_paths, self.F_out, self.T_out)
        if not self.keep_time_dimension:
            y = y[..., 0]                 # (B, n_paths, F_out)
        return y


if __name__ == "__main__":
    model = JTFS(J=3, Q=2, J_fr=2, Q_fr=1, T=16, F=2,
                 keep_time_dimension=False, fixed_duration=2.0)
    key = jax.random.PRNGKey(0)
    audio = jax.random.normal(key, (2, model.N), dtype=jnp.float32)  # (B=2, N=1024)
    y = model(audio)
    jax.block_until_ready(y)
    assert y.shape == (2, model.n_paths, model.F_out)
    assert bool(jnp.all(jnp.isfinite(y)))
    print("KERNEL_OK")
</pallas_src>

<mosaic_0001>
module attributes {stable_mosaic.version = 11 : i64} {
  func.func @_jtfs_kernel(%arg0: i32, %arg1: i32, %arg2: memref<1x64x128xbf16, #tpu.memory_space<vmem>>, %arg3: memref<16x64xbf16, #tpu.memory_space<vmem>>, %arg4: memref<1x128x256xbf16, #tpu.memory_space<vmem>>, %arg5: memref<32x8xbf16, #tpu.memory_space<vmem>>, %arg6: memref<12x32xbf16, #tpu.memory_space<vmem>>, %arg7: memref<128x1xbf16, #tpu.memory_space<vmem>>, %arg8: memref<1x1x12x1xf32, #tpu.memory_space<vmem>>, %arg9: memref<32x128xbf16, #tpu.memory_space<vmem>>) attributes {dimension_semantics = [#tpu.dimension_semantics<parallel>, #tpu.dimension_semantics<arbitrary>], iteration_bounds = array<i64: 2, 3>, scalar_prefetch = 0 : i64, scratch_operands = 1 : i64, tpu.core_type = #tpu.core_type<tc>, window_params = [{transform_indices = @transform_0, window_bounds = array<i64: 1, 64, 128>}, {pipeline_mode = #tpu.pipeline_mode<synchronous>, transform_indices = @transform_1, window_bounds = array<i64: 16, 64>}, {transform_indices = @transform_2, window_bounds = array<i64: 1, 128, 256>}, {pipeline_mode = #tpu.pipeline_mode<synchronous>, transform_indices = @transform_3, window_bounds = array<i64: 32, 8>}, {pipeline_mode = #tpu.pipeline_mode<synchronous>, transform_indices = @transform_4, window_bounds = array<i64: 12, 32>}, {pipeline_mode = #tpu.pipeline_mode<synchronous>, transform_indices = @transform_5, window_bounds = array<i64: 128, 1>}, {transform_indices = @transform_6, window_bounds = array<i64: 1, 1, 12, 1>}]} {
    %c0_i32 = arith.constant 0 : i32
    %0 = arith.cmpi eq, %arg1, %c0_i32 : i32
    %1 = arith.extui %0 : i1 to i32
    %c0_i32_0 = arith.constant 0 : i32
    %2 = arith.cmpi ne, %1, %c0_i32_0 : i32
    scf.if %2 {
      %c0_14 = arith.constant 0 : index
      %c0_15 = arith.constant 0 : index
      %34 = vector.load %arg3[%c0_14, %c0_15] : memref<16x64xbf16, #tpu.memory_space<vmem>>, vector<16x64xbf16>
      %c0_16 = arith.constant 0 : index
      %c0_17 = arith.constant 0 : index
      %c0_18 = arith.constant 0 : index
      %35 = vector.load %arg2[%c0_16, %c0_17, %c0_18] : memref<1x64x128xbf16, #tpu.memory_space<vmem>>, vector<1x64x128xbf16>
      %36 = vector.shape_cast %35 : vector<1x64x128xbf16> to vector<64x128xbf16>
      %cst_19 = arith.constant dense<0.000000e+00> : vector<16x128xf32>
      %37 = tpu.matmul %34, %36, %cst_19 {dimension_numbers = #tpu.dot_dimension_numbers<[1], [0], [0], [1], [0, 0, 1, 1], [], []>} : vector<16x64xbf16>, vector<64x128xbf16>, vector<16x128xf32> -> vector<16x128xf32>
      %38 = vector.extract_strided_slice %37 {offsets = [0, 0], sizes = [8, 128], strides = [1, 1]} : vector<16x128xf32> to vector<8x128xf32>
      %39 = vector.extract_strided_slice %37 {offsets = [8, 0], sizes = [8, 128], strides = [1, 1]} : vector<16x128xf32> to vector<8x128xf32>
      %40 = arith.mulf %38, %38 : vector<8x128xf32>
      %41 = arith.mulf %39, %39 : vector<8x128xf32>
      %42 = arith.addf %40, %41 : vector<8x128xf32>
      %43 = math.sqrt %42 : vector<8x128xf32>
      %c0_20 = arith.constant 0 : index
      %c0_21 = arith.constant 0 : index
      %44 = vector.load %arg5[%c0_20, %c0_21] : memref<32x8xbf16, #tpu.memory_space<vmem>>, vector<32x8xbf16>
      %45 = arith.truncf %43 : vector<8x128xf32> to vector<8x128xbf16>
      %cst_22 = arith.constant dense<0.000000e+00> : vector<32x128xf32>
      %46 = tpu.matmul %44, %45, %cst_22 {dimension_numbers = #tpu.dot_dimension_numbers<[1], [0], [0], [1], [0, 0, 1, 1], [], []>} : vector<32x8xbf16>, vector<8x128xbf16>, vector<32x128xf32> -> vector<32x128xf32>
      %47 = arith.truncf %46 : vector<32x128xf32> to vector<32x128xbf16>
      %c0_23 = arith.constant 0 : index
      %c0_24 = arith.constant 0 : index
      %48 = vector.load %arg9[%c0_23, %c0_24] : memref<32x128xbf16, #tpu.memory_space<vmem>>, vector<32x128xbf16>
      tpu.vector_store %arg9[%c0_23, %c0_24], %47 {strides = array<i32>} : memref<32x128xbf16, #tpu.memory_space<vmem>>, vector<32x128xbf16>,
    } else {
    }
    %c0 = arith.constant 0 : index
    %c0_1 = arith.constant 0 : index
    %3 = vector.load %arg9[%c0, %c0_1] : memref<32x128xbf16, #tpu.memory_space<vmem>>, vector<32x128xbf16>
    %c0_2 = arith.constant 0 : index
    %c0_3 = arith.constant 0 : index
    %c0_4 = arith.constant 0 : index
    %4 = vector.load %arg4[%c0_2, %c0_3, %c0_4] : memref<1x128x256xbf16, #tpu.memory_space<vmem>>, vector<1x128x256xbf16>
    %5 = vector.shape_cast %4 : vector<1x128x256xbf16> to vector<128x256xbf16>
    %cst = arith.constant dense<0.000000e+00> : vector<32x256xf32>
    %6 = tpu.matmul %3, %5, %cst {dimension_numbers = #tpu.dot_dimension_numbers<[1], [0], [0], [1], [0, 0, 1, 1], [], []>} : vector<32x128xbf16>, vector<128x256xbf16>, vector<32x256xf32> -> vector<32x256xf32>
    %7 = vector.extract_strided_slice %6 {offsets = [0, 0], sizes = [16, 128], strides = [1, 1]} : vector<32x256xf32> to vector<16x128xf32>
    %8 = vector.extract_strided_slice %6 {offsets = [0, 128], sizes = [16, 128], strides = [1, 1]} : vector<32x256xf32> to vector<16x128xf32>
    %9 = vector.extract_strided_slice %6 {offsets = [16, 0], sizes = [16, 128], strides = [1, 1]} : vector<32x256xf32> to vector<16x128xf32>
    %10 = vector.extract_strided_slice %6 {offsets = [16, 128], sizes = [16, 128], strides = [1, 1]} : vector<32x256xf32> to vector<16x128xf32>
    %11 = arith.subf %7, %10 : vector<16x128xf32>
    %12 = arith.addf %9, %8 : vector<16x128xf32>
    %13 = arith.addf %7, %10 : vector<16x128xf32>
    %14 = arith.subf %8, %9 : vector<16x128xf32>
    %15 = arith.mulf %11, %11 : vector<16x128xf32>
    %16 = arith.mulf %12, %12 : vector<16x128xf32>
    %17 = arith.addf %15, %16 : vector<16x128xf32>
    %18 = math.sqrt %17 : vector<16x128xf32>
    %19 = arith.mulf %13, %13 : vector<16x128xf32>
    %20 = arith.mulf %14, %14 : vector<16x128xf32>
    %21 = arith.addf %19, %20 : vector<16x128xf32>
    %22 = math.sqrt %21 : vector<16x128xf32>
    %23 = tpu.concatenate %18, %22 in 0 : vector<16x128xf32>, vector<16x128xf32> -> vector<32x128xf32>
    %24 = arith.truncf %23 : vector<32x128xf32> to vector<32x128xbf16>
    %c0_5 = arith.constant 0 : index
    %c0_6 = arith.constant 0 : index
    %25 = vector.load %arg6[%c0_5, %c0_6] : memref<12x32xbf16, #tpu.memory_space<vmem>>, vector<12x32xbf16>
    %cst_7 = arith.constant dense<0.000000e+00> : vector<12x128xf32>
    %26 = tpu.matmul %25, %24, %cst_7 {dimension_numbers = #tpu.dot_dimension_numbers<[1], [0], [0], [1], [0, 0, 1, 1], [], []>} : vector<12x32xbf16>, vector<32x128xbf16>, vector<12x128xf32> -> vector<12x128xf32>
    %cst_8 = arith.constant dense<0.000000e+00> : vector<12xf32>
    %27 = vector.multi_reduction <add>, %26, %cst_8 [1] : vector<12x128xf32> to vector<12xf32>
    %28 = vector.shape_cast %27 : vector<12xf32> to vector<12x1xf32>
    %cst_9 = arith.constant 1.280000e+02 : f32
    %29 = vector.broadcast %cst_9 : f32 to vector<12x1xf32>
    %30 = arith.divf %28, %29 : vector<12x1xf32>
    %c0_10 = arith.constant 0 : index
    %c0_11 = arith.constant 0 : index
    %c0_12 = arith.constant 0 : index
    %c0_13 = arith.constant 0 : index
    %31 = vector.load %arg8[%c0_10, %c0_11, %c0_12, %c0_13] : memref<1x1x12x1xf32, #tpu.memory_space<vmem>>, vector<1x1x12x1xf32>
    %32 = vector.shape_cast %31 : vector<1x1x12x1xf32> to vector<12x1xf32>
    %33 = vector.shape_cast %30 : vector<12x1xf32> to vector<1x1x12x1xf32>
    tpu.vector_store %arg8[%c0_10, %c0_11, %c0_12, %c0_13], %33 {strides = array<i32>} : memref<1x1x12x1xf32, #tpu.memory_space<vmem>>, vector<1x1x12x1xf32>,
    return
  }
  func.func @transform_0(%arg0: i32, %arg1: i32) -> (i32, i32, i32) {
    %c0_i32 = arith.constant 0 : i32
    %c0_i32_0 = arith.constant 0 : i32
    %c0_i32_1 = arith.constant 0 : i32
    return %arg0, %c0_i32, %c0_i32_0 : i32, i32, i32
  }
  func.func @transform_1(%arg0: i32, %arg1: i32) -> (i32, i32) {
    %c0_i32 = arith.constant 0 : i32
    %c0_i32_0 = arith.constant 0 : i32
    %c0_i32_1 = arith.constant 0 : i32
    return %c0_i32, %c0_i32_0 : i32, i32
  }
  func.func @transform_2(%arg0: i32, %arg1: i32) -> (i32, i32, i32) {
    %c0_i32 = arith.constant 0 : i32
    %c0_i32_0 = arith.constant 0 : i32
    %c0_i32_1 = arith.constant 0 : i32
    return %arg1, %c0_i32, %c0_i32_0 : i32, i32, i32
  }
  func.func @transform_3(%arg0: i32, %arg1: i32) -> (i32, i32) {
    %c0_i32 = arith.constant 0 : i32
    %c0_i32_0 = arith.constant 0 : i32
    %c0_i32_1 = arith.constant 0 : i32
    return %c0_i32, %c0_i32_0 : i32, i32
  }
  func.func @transform_4(%arg0: i32, %arg1: i32) -> (i32, i32) {
    %c0_i32 = arith.constant 0 : i32
    %c0_i32_0 = arith.constant 0 : i32
    %c0_i32_1 = arith.constant 0 : i32
    return %c0_i32, %c0_i32_0 : i32, i32
  }
  func.func @transform_5(%arg0: i32, %arg1: i32) -> (i32, i32) {
    %c0_i32 = arith.constant 0 : i32
    %c0_i32_0 = arith.constant 0 : i32
    %c0_i32_1 = arith.constant 0 : i32
    return %c0_i32, %c0_i32_0 : i32, i32
  }
  func.func @transform_6(%arg0: i32, %arg1: i32) -> (i32, i32, i32, i32) {
    %c0_i32 = arith.constant 0 : i32
    %c0_i32_0 = arith.constant 0 : i32
    %c0_i32_1 = arith.constant 0 : i32
    return %arg0, %arg1, %c0_i32, %c0_i32_0 : i32, i32, i32, i32
  }
}

</mosaic_0001>

<bundles_post_ra>
// kernel: tpu_custom_call.1
= control target key start
LH: loop header
LB: loop body
LE: loop exit
PB: predicated region body
PF: predicated region fallthrough
CT: control target
= control target key end

     0   :  { %11 = vsyncpa [#allocation4], 0  ;;  %s1404_s0 = inlined_call_operand.vmem [shape: bf16[2,64,128], index: 0, kind: input, shape index: {}]   ;;  %s1405_s1 = inlined_call_operand.vmem [shape: bf16[16,64], index: 1, kind: input, shape index: {}]   ;;  %s1406_s2 = inlined_call_operand.hbm [shape: bf16[3,128,256], index: 2, kind: input, shape index: {}]   ;;  %s1407_s3 = inlined_call_operand.vmem [shape: bf16[32,8], index: 3, kind: input, shape index: {}]   ;;  %s1408_s4 = inlined_call_operand.vmem [shape: bf16[12,32], index: 4, kind: input, shape index: {}]   ;;  %s1409_s5 = inlined_call_operand.vmem [shape: bf16[128,1], index: 5, kind: input, shape index: {}]   ;;  %s1410_s6 = inlined_call_operand.vmem [shape: f32[2,3,12,1], index: 6, kind: output, shape index: {}]  }
   0x1   :  { %13 = vsyncpa [#allocation4 + $0x1], 0  ;;  %s1214_s21 = smov 0   ;;  %s1216_s22 = smov 0  }
   0x2   :  { %s1218_s23 = smov 0   ;;  %s1220_s24 = smov 0  }
   0x3   :  { %s1222_s25 = smov 0   ;;  %s1224_s26 = smov 0  }
   0x4   :  { %s1226_s27 = smov 0   ;;  %s1228_s5 = smov 0  }
   0x5 LB: > { %s868_s28 = sadd.s32 4294967295, %s1169_s5   ;;  %s28_s29 = sadd.s32 1, %s1161_s26  ;;  %s1169_s5 = sphi %s1228_s5, %s19_s5   ;;  %s1165_s27 = sphi %s1226_s27, %s1420_s27   ;;  %s1161_s26 = sphi %s1224_s26, %s1419_s26   ;;  %s1157_s25 = sphi %s1222_s25, %s1418_s25   ;;  %s1153_s24 = sphi %s1220_s24, %s1417_s24   ;;  %s1149_s23 = sphi %s1218_s23, %s1416_s23   ;;  %s1145_s22 = sphi %s1216_s22, %s1415_s22   ;;  %s1141_s21 = sphi %s1214_s21, %s1414_s21  }
   0x6   : > { %p29_p0 = scmp.ge.s32.totalorder %s28_s29, 3  ;;  %s31_s30 = sadd.s32 1, %s1165_s27 }
   0x7   : > { %s85_s7 = sadd.s32 1, %s1149_s23  ;;  %p92_p1 = scmp.ne.s32.totalorder %s1149_s23, %s1145_s22 }
   0x8   : > { %s1422_s29 = smov (%p29_p0, %s28_s29), 0  ;;  %s1424_s30 = smov (!%p29_p0, %s31_s30), %s1165_s27 }
   0x9   : > { %s82_s8 = ssub.s32 %s1161_s26, %s1422_s29  ;;  %p93_p2 = scmp.eq.s32.totalorder %s1169_s5, 0 }
   0xa   : > { %p33_p3 = scmp.ge.s32.totalorder %s1424_s30, 2  ;;  %p83_p4 = scmp.eq.s32.totalorder %s82_s8, 0 }
   0xb   : > { %p1264_p5 = por %p93_p2, %p92_p1  ;;  %p98_p6 = scmp.ne.s32.totalorder %s1145_s22, %s1141_s21 }
   0xc   : > { %s1426_s30 = smov (%p33_p3, %s1424_s30), 0  ;;  %p99_p7 = scmp.eq.s32.totalorder %s868_s28, 0 }
   0xd   : > { %s1272_s10 = scalar_select %p83_p4, %s1149_s23, %s85_s7  }
   0xe   : > { %p959_p8 = scmp.lt.s32.totalorder %s1169_s5, 6  ;;  %s233_s11 = sand.u32 1, %s1149_s23  }
   0xf   : > { %p1276_p9 = por %p99_p7, %p98_p6  ;;  %s872_s13 = sshll.u32 %s233_s11, 7 }
  0x10   : > { %s912_s14 = sshll.u32 %s1161_s26, 11  ;;  %s237_s18 = scalar_lea.vmem [#allocation3], %s872_s13 }
  0x11   : > { %s1284_s17 = scalar_lea.hbm %s1406_s2, %s912_s14  ;;  %s244_s19 = sshll.u32 %s237_s18, 4  ;;  %s1292_s19 = int_to_ptr.vmem [resolvable:$true] %s244_s19 }
  0x12   : > { %p1288_p10 = pnand %p959_p8, %p1264_p5  ;;  %s1294_s21 = scalar_lea.sflag [#allocation4], %s233_s11 }
  0x13   : > { %s1073_s28 = scalar_lea.hbm %s1284_s17, 2048  ;;  %s1078_s9 = scalar_lea.hbm %s1406_s2, 6144 }
  0x14   : > { %p1074_p11 = scmp.ne.s32.totalorder %s1284_s17, %s1073_s28  ;;  %p1075_p12 = pneg %p1288_p10 }
  0x15   : > { %p1079_p1 = scmp.lt.u32.totalorder %s1284_s17, %s1406_s2  ;;  %p1080_p2 = scmp.lt.u32.totalorder %s1078_s9, %s1073_s28 }
  0x16   : > { %p1076_p13 = pnand %p1075_p12, %p1074_p11  ;;  %p1082_p4 = scmp.lt.u32.totalorder %s1073_s28, %s1284_s17 }
  0x17   : > { %p1081_p3 = por %p1080_p2, %p1079_p1 }
  0x18   : > { %p1077_p0 = pneg %p1076_p13 }
  0x19   : > { %p1083_p5 = por %p1082_p4, %p1081_p3 }
  0x1b   : > { %p1084_p6 = pnand %p1083_p5, %p1077_p0 }
  0x1d   : > { %1087 = shalt.err (!%p1084_p6)
}
  0x1e   : > { %s1088_s11 = scalar_lea.vmem %s1292_s19, 2048  ;;  %s1171_s15 = smov [#allocation3]  }
  0x1f   : > { %p1089_p7 = scmp.ne.s32.totalorder %s1292_s19, %s1088_s11  ;;  %s1093_s16 = sshll.u32 %s1171_s15, 4  ;;  %s1094_s16 = int_to_ptr.vmem [resolvable:$false] %s1093_s16 }
  0x20   : > { %s1095_s18 = scalar_lea.vmem %s1094_s16, 4096  ;;  %p1096_p13 = scmp.lt.s32.totalorder %s1292_s19, %s1094_s16 }
  0x21   : > { %p1091_p8 = pnand %p1089_p7, %p1075_p12  ;;  %p1097_p1 = scmp.lt.s32.totalorder %s1095_s18, %s1088_s11 }
  0x23   : > { %p1092_p11 = pneg %p1091_p8  ;;  %p1098_p2 = por %p1097_p1, %p1096_p13 }
  0x25   : > { %p1099_p3 = pnand %p1098_p2, %p1092_p11 }
  0x27   : > { %1102 = shalt.err (!%p1099_p3)
}
  0x28   : > { %s1172_s28 = smov 128   ;;  %s1173_s7 = smov 8  }
  0x29   : > { %958 = dma.hbm_to_vmem [thread:$0]  (!%p1288_p10), %s1284_s17, 2048, %s1292_s19, %s1294_s21, %s1172_s28, %s1172_s28, %s1173_s7  }
  0x2a   : > { %p875_p12 = scmp.ge.s32.totalorder %s1169_s5, 1  ;;  %p252_p0 = scmp.lt.s32.totalorder %s1169_s5, 7 }
  0x2c   : > { %p253_p4 = pnand %p875_p12, %p252_p0 }
  0x2d   : > { %s258_s8 = sand.u32 (!%p253_p4), 1, %s1145_s22  }
  0x2e   : > { %256 = sbr.rel (%p253_p4) target bundleno = 1181 (0x49d), region = 44  ;;  %s876_s9 = sshll.u32 (!%p253_p4), %s258_s8, 7 }
  0x2f   : > { %s259_s13 = scalar_lea.sflag (!%p253_p4), [#allocation4], %s258_s8  ;;  %s1325_s14 = scalar_lea.vmem (!%p253_p4), [#allocation3], %s876_s9 }
  0x35   : > { %1136 = dma.done.wait (%p1276_p9), %s259_s13, 2048  }
  0x36   : > { %1138 = vsyncadd (%p1276_p9), %s259_s13, 4294965248  ;;  %p300_p10 = scmp.lt.s32.totalorder %s1157_s25, 1  ;;  %p307_p5 = scmp.lt.s32.totalorder %s1153_s24, 2 }
  0x37   : > { %p881_p9 = scmp.ne.s32.totalorder %s1153_s24, 0 }
  0x38   : > { %s1428_s25 = smov (!%p300_p10, %s1157_s25), 1  ;;  %v1174_v1 = vmov (!%p881_p9), 0.0   ;;  %vm1175_vm0 = vmmov (!%p881_p9), 0   ;;  %v1035_v5 = vld [vmem:[%s1405_s1] sm:$0xff] (!%p881_p9)   ;;  %vm358_vm1 = vcmask (!%p881_p9), 523264   ;;  %vm428_vm2 = vcmask (!%p881_p9), 64512  }
  0x39   : > { %s308_s17 = scalar_select %p307_p5, %s1153_s24, 2 }
  0x3a   : > { %s913_s19 = sshll.u32 %s1428_s25, 5  ;;  %s952_s20 = smul.u32 6, %s1428_s25  ;;  %925 = vmatprep.subr.bf16.mxu0 (!%p881_p9), %v1174_v1  ;;  %933 = vmatprep.mubr.msk.bf16.mxu0 (!%p881_p9), %vm1175_vm0, %v1174_v1  ;;  %v1036_v6 = vld [vmem:[%s1407_s3] sm:$0xff] (!%p881_p9)   ;;  %vm435_vm5 = vcmask (!%p881_p9), 1043456   ;;  %v1037_v21 = vld [vmem:[%s1407_s3 + $0x8] sm:$0xff] (!%p881_p9)  }
  0x3b   : > { %s304_s15 = scalar_lea.vmem %s1404_s0, %s913_s19  ;;  %s879_s16 = sshll.u32 %s308_s17, 1  ;;  %939 = vmatprep.mubr.msk.bf16.mxu1 (!%p881_p9), %vm428_vm2, %v1036_v6 }
  0x3c   : > { %s311_s18 = sadd.s32 %s952_s20, %s879_s16  ;;  %318 = sbr.rel (%p881_p9) target bundleno = 533 (0x215), region = 52  ;;  %v1031_v0 = vld [vmem:[%s304_s15] sm:$0xff] (!%p881_p9)   ;;  %v1032_v2 = vld [vmem:[%s304_s15 + $0x8] sm:$0xff] (!%p881_p9)   ;;  %v1033_v3 = vld [vmem:[%s304_s15 + $0x10] sm:$0xff] (!%p881_p9)  }
  0x3d   : > { %s880_s28 = sshll.u32 %s311_s18, 3  ;;  %926 = vmatpush3.bf16.msra.mxu0 (!%p881_p9), %v1031_v0  ;;  %v1034_v4 = vld [vmem:[%s304_s15 + $0x18] sm:$0xff] (!%p881_p9)  }
  0x3e   : > { %s1341_s8 = scalar_lea.vmem %s1410_s6, %s880_s28  ;;  %927 = vmatprep.subr.bf16.mxu0 (!%p881_p9), %v1174_v1 }
  0x41   : > { %928 = vmatpush3.bf16.msra.mxu0 (!%p881_p9), %v1032_v2 }
  0x42   : > { %929 = vmatprep.subr.bf16.mxu0 (!%p881_p9), %v1174_v1 }
  0x45   : > { %930 = vmatpush3.bf16.msra.mxu0 %v1033_v3 }
  0x46   : > { %931 = vmatprep.subr.bf16.mxu0 %v1174_v1 }
  0x49   : > { %932 = vmatpush3.bf16.msra.mxu0 %v1034_v4 }
  0x4c   : > { %934 = vmatmul.mubr.msk.bf16.vlgmr.msra.gmra.mrb[0].mxu0 %vm358_vm1, %v1035_v5 }
 0x11f   : > { %v396_v7 = vpop.f32.mrb[0].mxu0 }
 0x120   : > { %v935_v8 = vpop.f32.mrb[1].mxu0  ;;  %v403_v10 = vmul.f32 %v396_v7, %v396_v7 }
 0x121   : > { %v399_v9 = vpop.f32.mrb[2].mxu0 }
 0x122   : > { %v404_v11 = vmul.f32 %v399_v9, %v399_v9  ;;  %v936_v12 = vpop.f32.mrb[3].mxu0 }
 0x124   : > { %v405_v13 = vadd.f32 %v404_v11, %v403_v10 }
 0x126   : > { %1038 = vrsqrt.f32 %v405_v13  ;;  %vm408_vm3 = vcmp.eq.f32.partialorder %v405_v13, inf  ;;  %v411_v16 = vand.u32 2147483648, %v405_v13  ;;  %vm410_vm4 = vcmp.eq.f32.partialorder %v405_v13, 0.0 }
 0x130   : > { %v1039_v14 = vpop.eup %1038 }
 0x131   : > { %v407_v15 = vmul.f32 %v1039_v14, %v405_v13 }
 0x133   : > { %v409_v17 = vsel %vm408_vm3, %v405_v13, %v407_v15 }
 0x134   : > { %v412_v18 = vsel %vm410_vm4, %v411_v16, %v409_v17 }
 0x135   : > { %v417_v19 = vpack.c.bf16 %v412_v18, %v412_v18 }
 0x137   : > { %951 = vmatprep.subr.msk.bf16.mxu1 %vm435_vm5, %v417_v19  ;;  %v437_v20 = vsel %vm435_vm5, %v417_v19, 0 }
 0x138   : > { %938 = vmatpush3.bf16.msra.mxu1 %v437_v20 }
 0x13b   : > { %940 = vmatmul.mubr.msk.bf16.vlgmr.msra.gmra.mrb[0].mxu1 %vm428_vm2, %v1037_v21 }
 0x20e   : > { %v941_v22 = vpop.f32.mrb[0].mxu1 }
 0x20f   : > { %v473_v23 = vpop.f32.mrb[1].mxu1 }
 0x210   : > { %v942_v24 = vpop.f32.mrb[2].mxu1 }
 0x211   : > { %v489_v25 = vpack.c.bf16 %v942_v24, %v941_v22  ;;  %v476_v26 = vpop.f32.mrb[3].mxu1 }
 0x212   : > { %v488_v27 = vpack.c.bf16 %v476_v26, %v473_v23 }
 0x213   : > { %491 = vst [vmem:[#allocation2 + $0x8] sm:$0xff] %v489_v25 }
 0x214   : > { %490 = vst [vmem:[#allocation2] sm:$0xff] %v488_v27 }
 0x215 PF: > { %v1040_v28 = vld [vmem:[%s1325_s14 + $0x4] ss:$8 sps:$4 sm:$0xff]   ;;  %v1042_v29 = vld [vmem:[%s1325_s14] ss:$8 sps:$4 sm:$0xff]   ;;  %v1176_v30 = vmov 0   ;;  %v1177_v47 = vmov 0.0  }
 0x216   : > { %622 = vmatprep.mubr.bf16.mxu0 %v1176_v30  ;;  %590 = vmatprep.subr.bf16.mxu0 %v1040_v28  ;;  %v1043_v31 = vld [vmem:[%s1325_s14 + $0x14] ss:$8 sps:$4 sm:$0xff]   ;;  %v1045_v32 = vld [vmem:[%s1325_s14 + $0x10] ss:$8 sps:$4 sm:$0xff]   ;;  %v1046_v33 = vld [vmem:[%s1325_s14 + $0x24] ss:$8 sps:$4 sm:$0xff]  }
 0x217   : > { %591 = vmatpush1.bf16.msra.mxu0 %v1042_v29  ;;  %v1048_v34 = vld [vmem:[%s1325_s14 + $0x20] ss:$8 sps:$4 sm:$0xff]   ;;  %v1049_v35 = vld [vmem:[%s1325_s14 + $0x34] ss:$8 sps:$4 sm:$0xff]   ;;  %v1051_v36 = vld [vmem:[%s1325_s14 + $0x30] ss:$8 sps:$4 sm:$0xff]   ;;  %943 = vmatprep.subr.bf16.mxu1 %v1177_v47 }
 0x218   : > { %592 = vmatprep.subr.bf16.mxu0 %v1043_v31  ;;  %v1052_v37 = vld [vmem:[%s1325_s14 + $0x44] ss:$8 sps:$4 sm:$0xff]   ;;  %v1054_v38 = vld [vmem:[%s1325_s14 + $0x40] ss:$8 sps:$4 sm:$0xff]   ;;  %v1055_v39 = vld [vmem:[%s1325_s14 + $0x54] ss:$8 sps:$4 sm:$0xff]  }
 0x219   : > { %v1057_v40 = vld [vmem:[%s1325_s14 + $0x50] ss:$8 sps:$4 sm:$0xff]   ;;  %v1058_v41 = vld [vmem:[%s1325_s14 + $0x64] ss:$8 sps:$4 sm:$0xff]   ;;  %v1060_v42 = vld [vmem:[%s1325_s14 + $0x60] ss:$8 sps:$4 sm:$0xff]  }
 0x21a   : > { %v1061_v43 = vld [vmem:[%s1325_s14 + $0x74] ss:$8 sps:$4 sm:$0xff]   ;;  %v1063_v44 = vld [vmem:[%s1325_s14 + $0x70] ss:$8 sps:$4 sm:$0xff]   ;;  %vm1178_vm6 = vmmov 0   ;;  %vm700_vm15 = vcmask 261120  }
 0x21b   : > { %593 = vmatpush1.bf16.msra.mxu0 %v1045_v32  ;;  %v492_v45 = vld [vmem:[#allocation2] sm:$0xff]  ;;  %v493_v46 = vld [vmem:[#allocation2 + $0x8] sm:$0xff]  ;;  %947 = vmatprep.mubr.msk.bf16.mxu1 %vm1178_vm6, %v1177_v47  ;;  %vm747_vm0 = vcmask 1043456   ;;  %vm754_vm1 = vcmask 7168   ;;  %vm756_vm2 = vcmask 3072  }
 0x21c   : > { %594 = vmatprep.subr.bf16.mxu0 %v1046_v33 }
 0x21f   : > { %595 = vmatpush1.bf16.msra.mxu0 %v1048_v34  ;;  %v1064_v34 = vld [vmem:[%s1408_s4] sm:$0x3f]  }
 0x220   : > { %596 = vmatprep.subr.bf16.mxu0 %v1049_v35 }
 0x223   : > { %597 = vmatpush1.bf16.msra.mxu0 %v1051_v36 }
 0x224   : > { %598 = vmatprep.subr.bf16.mxu0 %v1052_v37 }
 0x227   : > { %599 = vmatpush1.bf16.msra.mxu0 %v1054_v38 }
 0x228   : > { %600 = vmatprep.subr.bf16.mxu0 %v1055_v39 }
 0x22b   : > { %601 = vmatpush1.bf16.msra.mxu0 %v1057_v40 }
 0x22c   : > { %602 = vmatprep.subr.bf16.mxu0 %v1058_v41 }
 0x22f   : > { %603 = vmatpush1.bf16.msra.mxu0 %v1060_v42 }
 0x230   : > { %604 = vmatprep.subr.bf16.mxu0 %v1061_v43 }
 0x233   : > { %605 = vmatpush1.bf16.msra.mxu0 %v1063_v44 }
 0x236   : > { %623 = vmatmul.mubr.bf16.vlgmr.msra.gmra.mrb[0].mxu0 %v492_v45 }
 0x237   : > { %632 = vmatprep.mubr.bf16.mxu0 %v1176_v30 }
 0x23e   : > { %633 = vmatmul.mubr.bf16.gmra.mrb[4].mxu0 %v493_v46 }
 0x309   : > { %v624_v48 = vpop.f32.mrb[0].mxu0 }
 0x30a   : > { %v626_v49 = vpop.f32.mrb[1].mxu0 }
 0x30b   : > { %v628_v50 = vpop.f32.mrb[2].mxu0 }
 0x30c   : > { %v630_v51 = vpop.f32.mrb[3].mxu0 }
 0x311   : > { %v634_v52 = vpop.f32.mrb[4].mxu0 }
 0x312   : > { %v645_v53 = vadd.f32 %v634_v52, %v626_v49  ;;  %v649_v54 = vsub.f32 %v626_v49, %v634_v52  ;;  %v636_v55 = vpop.f32.mrb[5].mxu0 }
 0x313   : > { %v643_v56 = vsub.f32 %v624_v48, %v636_v55  ;;  %v647_v57 = vadd.f32 %v636_v55, %v624_v48  ;;  %v638_v58 = vpop.f32.mrb[6].mxu0 }
 0x314   : > { %v653_v59 = vmul.f32 %v645_v53, %v645_v53  ;;  %v673_v60 = vmul.f32 %v649_v54, %v649_v54  ;;  %v646_v61 = vadd.f32 %v638_v58, %v630_v51  ;;  %v650_v62 = vsub.f32 %v630_v51, %v638_v58  ;;  %v640_v63 = vpop.f32.mrb[7].mxu0 }
 0x315   : > { %v651_v0 = vmul.f32 %v643_v56, %v643_v56  ;;  %v671_v1 = vmul.f32 %v647_v57, %v647_v57  ;;  %v644_v2 = vsub.f32 %v628_v50, %v640_v63  ;;  %v648_v3 = vadd.f32 %v640_v63, %v628_v50 }
 0x316   : > { %v654_v4 = vmul.f32 %v646_v61, %v646_v61  ;;  %v674_v5 = vmul.f32 %v650_v62, %v650_v62 }
 0x317   : > { %v655_v6 = vadd.f32 %v653_v59, %v651_v0  ;;  %v675_v7 = vadd.f32 %v673_v60, %v671_v1  ;;  %v652_v8 = vmul.f32 %v644_v2, %v644_v2  ;;  %v672_v9 = vmul.f32 %v648_v3, %v648_v3 }
 0x319   : > { %1065 = vrsqrt.f32 %v675_v7  ;;  %v656_v10 = vadd.f32 %v654_v4, %v652_v8  ;;  %v676_v11 = vadd.f32 %v674_v5, %v672_v9  ;;  %vm659_vm7 = vcmp.eq.f32.partialorder %v655_v6, inf }
 0x31a   : > { %1067 = vrsqrt.f32 %v655_v6  ;;  %vm661_vm8 = vcmp.eq.f32.partialorder %v655_v6, 0.0  ;;  %v662_v17 = vand.u32 2147483648, %v655_v6  ;;  %vm679_vm9 = vcmp.eq.f32.partialorder %v675_v7, inf }
 0x31b   : > { %1069 = vrsqrt.f32 %v676_v11  ;;  %vm666_vm10 = vcmp.eq.f32.partialorder %v656_v10, inf  ;;  %v682_v20 = vand.u32 2147483648, %v675_v7  ;;  %vm686_vm11 = vcmp.eq.f32.partialorder %v676_v11, inf }
 0x31c   : > { %1071 = vrsqrt.f32 %v656_v10  ;;  %v689_v24 = vand.u32 2147483648, %v676_v11  ;;  %v669_v25 = vand.u32 2147483648, %v656_v10  ;;  %vm681_vm12 = vcmp.eq.f32.partialorder %v675_v7, 0.0 }
 0x31d   : > { %vm688_vm13 = vcmp.eq.f32.partialorder %v676_v11, 0.0  ;;  %vm668_vm14 = vcmp.eq.f32.partialorder %v656_v10, 0.0 }
 0x323   : > { %v1066_v12 = vpop.eup %1065 }
 0x324   : > { %v1068_v13 = vpop.eup %1067  ;;  %v678_v14 = vmul.f32 %v1066_v12, %v675_v7 }
 0x325   : > { %v1070_v15 = vpop.eup %1069  ;;  %v658_v16 = vmul.f32 %v1068_v13, %v655_v6 }
 0x326   : > { %v1072_v18 = vpop.eup %1071  ;;  %v680_v19 = vsel %vm679_vm9, %v675_v7, %v678_v14  ;;  %v685_v21 = vmul.f32 %v1070_v15, %v676_v11 }
 0x327   : > { %v660_v22 = vsel %vm659_vm7, %v655_v6, %v658_v16  ;;  %v665_v23 = vmul.f32 %v1072_v18, %v656_v10  ;;  %v683_v28 = vsel %vm681_vm12, %v682_v20, %v680_v19 }
 0x328   : > { %v687_v26 = vsel %vm686_vm11, %v676_v11, %v685_v21  ;;  %v663_v30 = vsel %vm661_vm8, %v662_v17, %v660_v22 }
 0x329   : > { %v667_v27 = vsel %vm666_vm10, %v656_v10, %v665_v23  ;;  %v690_v29 = vsel %vm688_vm13, %v689_v24, %v687_v26 }
 0x32a   : > { %v670_v31 = vsel %vm668_vm14, %v669_v25, %v667_v27  ;;  %v692_v32 = vpack.c.bf16 %v690_v29, %v683_v28 }
 0x32b   : > { %v691_v33 = vpack.c.bf16 %v670_v31, %v663_v30 }
 0x32d   : > { %944 = vmatpush3.bf16.msra.mxu1 %v691_v33 }
 0x32e   : > { %945 = vmatprep.subr.bf16.mxu1 %v1177_v47 }
 0x331   : > { %946 = vmatpush3.bf16.msra.mxu1 %v692_v32 }
 0x334   : > { %948 = vmatmul.mubr.msk.bf16.vlgmr.msra.gmra.mrb[0].mxu1 %vm700_vm15, %v1064_v34 }
 0x407   : > { %v738_v35 = vpop.f32.mrb[0].mxu1 }
 0x408   : > { %745 = vadd.xlane.f32.xlu0 %v738_v35  ;;  %v949_v36 = vpop.f32.mrb[1].mxu1 }
 0x409   : > { %v741_v37 = vpop.f32.mrb[2].mxu1 }
 0x40a   : > { %v950_v38 = vpop.f32.mrb[3].mxu1  ;;  %v748_v39 = vsel %vm747_vm0, %v741_v37, 0.0 }
 0x40c   : > { %749 = vadd.xlane.f32.xlu0 %v748_v39 }
 0x495   : > { %v746_v40 = vpop.xlane.xlu0 %745 }
 0x496   : > { %v752_v41 = vmul.f32 0.0078125, %v746_v40 }
 0x498   : > { %755 = vst.msk [vmem:[%s1341_s8] sm:$0xff] %vm754_vm1, %v752_v41 }
 0x499   : > { %v750_v42 = vpop.xlane.xlu0 %749 }
 0x49a   : > { %v753_v43 = vmul.f32 0.0078125, %v750_v42 }
 0x49c   : > { %757 = vst.msk [vmem:[%s1341_s8 + $0x8] sm:$0xf] %vm756_vm2, %v753_v43 }
 0x49d PF: > { %s19_s5 = sadd.s32 1, %s1169_s5   ;;  %s1414_s21 = smov %s1145_s22 }
 0x49e   : > { %p16_p6 = scmp.ge.s32.totalorder %s19_s5, 8   ;;  %s1415_s22 = smov %s1149_s23 }
 0x49f   : > { %s1416_s23 = smov %s1272_s10  ;;  %s1417_s24 = smov %s1161_s26 }
 0x4a0   : > { %s1418_s25 = smov %s1165_s27  ;;  %s1419_s26 = smov %s1422_s29 }
 0x4a1   : > { %s1420_s27 = smov %s1426_s30  ;;  %18 = sbr.rel (!%p16_p6) target bundleno = 5 (0x5), region = 91 }
 0x4a8   :  { %787 = vsyncpa [#allocation4], 1 }
 0x4a9   :  { %789 = vsyncpa [#allocation4 + $0x1], 1 }

</bundles_post_ra>
